<compile_context>
chip_gen: v7x
topology: tpu7x:2x2x1
jax: 0.10.0
libtpu: 0.0.40
codegen_flags: <defaults>
</compile_context>

<pallas_src>
import jax
import jax.numpy as jnp
from jax.experimental import pallas as pl
from jax.experimental.pallas import tpu as pltpu


def lstm_encoder_kernel(x_ref, wih_ref, whh_ref, b_ref, out_ref):
    TB, F = x_ref.shape                 # x is time-major, flattened: (T*B_pad, F)
    H4 = whh_ref.shape[1]
    H = H4 // 4
    B = out_ref.shape[0]                # sublane-padded batch
    T = TB // B

    whh = whh_ref[...]                                          # (H, 4H), load once

    # Input projection for ALL timesteps at once (no sequential dependency):
    # a single (T*B, F) @ (F, 4H) MXU push; fused bias folded in here, off the
    # recurrent critical path.
    gx_all = jnp.dot(x_ref[...], wih_ref[...],
                     preferred_element_type=jnp.float32)
    gx_all = gx_all + jnp.broadcast_to(b_ref[...], (TB, H4))    # (T*B, 4H)

    # g-gate columns [2H, 3H) use tanh; i/f/o use sigmoid via the identity
    # sigmoid(x) = 0.5*tanh(x/2) + 0.5  -> one full-width EUP tanh per step.
    lane = jax.lax.broadcasted_iota(jnp.int32, (B, H4), 1)
    g_mask = (lane >= 2 * H) & (lane < 3 * H)                   # hoisted

    h = jnp.zeros((B, H), jnp.float32)
    c = jnp.zeros((B, H), jnp.float32)

    # T is small (8): fully unrolled static loop; slices are static and
    # 8-sublane aligned (one vreg each).
    for t in range(T):
        gx_t = gx_all[t * B:(t + 1) * B, :]                     # (B, 4H)
        gates = gx_t + jnp.dot(h, whh,
                               preferred_element_type=jnp.float32)
        pre = jnp.where(g_mask, gates, 0.5 * gates)
        th = jnp.tanh(pre)                                      # single EUP pass
        act = jnp.where(g_mask, th, 0.5 * th + 0.5)             # gate order i,f,g,o

        i_g = act[:, 0 * H:1 * H]
        f_g = act[:, 1 * H:2 * H]
        g_g = act[:, 2 * H:3 * H]
        o_g = act[:, 3 * H:4 * H]

        c = f_g * c + i_g * g_g
        h = o_g * jnp.tanh(c)

    # h_n -> ReLU -> (dropout = identity at inference)
    out_ref[...] = jnp.maximum(h, 0.0).astype(out_ref.dtype)


def lstm_encoder_forward(x_btf, w_ih, w_hh, b_ih, b_hh):
    """x_btf: (B, T, F) batch-first, like the PyTorch module input."""
    B, T, F = x_btf.shape
    H = w_hh.shape[1]
    B_pad = ((B + 7) // 8) * 8                        # pad batch to 8 sublanes

    # Time-major + batch-padded + flattened to 2D: the in-kernel input
    # projection becomes one MXU push and each per-step slice is one
    # lane-dense (8, 4H) tile.  This wrapper transpose is on ~4 KB: free.
    x_t = jnp.transpose(x_btf.astype(jnp.float32), (1, 0, 2))   # (T, B, F)
    if B_pad != B:
        x_t = jnp.pad(x_t, ((0, 0), (0, B_pad - B), (0, 0)))
    x_flat = x_t.reshape(T * B_pad, F)

    w_ih_t = w_ih.T.astype(jnp.float32)               # (F, 4H)
    w_hh_t = w_hh.T.astype(jnp.float32)               # (H, 4H)
    b = (b_ih + b_hh).reshape(1, 4 * H).astype(jnp.float32)

    out = pl.pallas_call(
        lstm_encoder_kernel,
        out_shape=jax.ShapeDtypeStruct((B_pad, H), jnp.float32),
        grid_spec=pl.GridSpec(
            grid=(1,),                                # single invocation
            in_specs=[
                pl.BlockSpec((T * B_pad, F), lambda i: (0, 0)),
                pl.BlockSpec((F, 4 * H), lambda i: (0, 0)),
                pl.BlockSpec((H, 4 * H), lambda i: (0, 0)),
                pl.BlockSpec((1, 4 * H), lambda i: (0, 0)),
            ],
            out_specs=pl.BlockSpec((B_pad, H), lambda i: (0, 0)),
        ),
        compiler_params=pltpu.CompilerParams(
            dimension_semantics=("arbitrary",)),
    )(x_flat, w_ih_t, w_hh_t, b)

    out = out[:B].astype(x_btf.dtype)                 # drop batch padding
    # PyTorch: out = dropout(relu(h_n)).squeeze() ; h_n is (1, B, H)
    return jnp.squeeze(out)


def ref_lstm_encoder(x_btf, w_ih, w_hh, b_ih, b_hh):
    """Pure-JAX reference (PyTorch nn.LSTM semantics) for correctness check."""
    B, T, F = x_btf.shape
    H = w_hh.shape[1]

    def step(carry, x_t):
        h, c = carry
        gates = x_t @ w_ih.T + b_ih + h @ w_hh.T + b_hh
        i, f, g, o = jnp.split(gates, 4, axis=-1)
        i, f, o = jax.nn.sigmoid(i), jax.nn.sigmoid(f), jax.nn.sigmoid(o)
        g = jnp.tanh(g)
        c = f * c + i * g
        h = o * jnp.tanh(c)
        return (h, c), h

    init = (jnp.zeros((B, H), jnp.float32), jnp.zeros((B, H), jnp.float32))
    (h_n, _), _ = jax.lax.scan(step, init, jnp.transpose(x_btf, (1, 0, 2)))
    return jnp.squeeze(jax.nn.relu(h_n))


if __name__ == "__main__":
    # Module hyperparameters: n_features=16, embedding_dim=32 (hidden of rnn1).
    B, T, F, H = 4, 8, 16, 32
    key = jax.random.PRNGKey(0)
    kx, k1, k2, k3, k4 = jax.random.split(key, 5)

    # Deterministic params, PyTorch-style uniform(-1/sqrt(H), 1/sqrt(H)).
    s = 1.0 / jnp.sqrt(jnp.float32(H))
    w_ih = jax.random.uniform(k1, (4 * H, F), jnp.float32, -s, s)
    w_hh = jax.random.uniform(k2, (4 * H, H), jnp.float32, -s, s)
    b_ih = jax.random.uniform(k3, (4 * H,), jnp.float32, -s, s)
    b_hh = jax.random.uniform(k4, (4 * H,), jnp.float32, -s, s)

    x = jax.random.normal(kx, (B, T, F), jnp.float32)

    out = lstm_encoder_forward(x, w_ih, w_hh, b_ih, b_hh)
    out = jax.block_until_ready(out)

    ref = jax.block_until_ready(ref_lstm_encoder(x, w_ih, w_hh, b_ih, b_hh))
    assert out.shape == (B, H), out.shape
    # Slightly relaxed vs 1e-5: sigmoid-via-tanh identity is exact but the HW
    # tanh approximation can differ from the sigmoid lowering by a few ULPs.
    assert jnp.allclose(out, ref, atol=2e-5, rtol=2e-5), "mismatch vs reference"

    print("KERNEL_OK")
</pallas_src>

<mosaic_0001>
module attributes {stable_mosaic.version = 11 : i64} {
  func.func @lstm_encoder_kernel(%arg0: i32, %arg1: memref<64x16xf32, #tpu.memory_space<vmem>>, %arg2: memref<16x128xf32, #tpu.memory_space<vmem>>, %arg3: memref<32x128xf32, #tpu.memory_space<vmem>>, %arg4: memref<1x128xf32, #tpu.memory_space<vmem>>, %arg5: memref<8x32xf32, #tpu.memory_space<vmem>>) attributes {dimension_semantics = [#tpu.dimension_semantics<arbitrary>], iteration_bounds = array<i64: 1>, scalar_prefetch = 0 : i64, scratch_operands = 0 : i64, tpu.core_type = #tpu.core_type<tc>, window_params = [{pipeline_mode = #tpu.pipeline_mode<synchronous>, transform_indices = @transform_0, window_bounds = array<i64: 64, 16>}, {pipeline_mode = #tpu.pipeline_mode<synchronous>, transform_indices = @transform_1, window_bounds = array<i64: 16, 128>}, {pipeline_mode = #tpu.pipeline_mode<synchronous>, transform_indices = @transform_2, window_bounds = array<i64: 32, 128>}, {pipeline_mode = #tpu.pipeline_mode<synchronous>, transform_indices = @transform_3, window_bounds = array<i64: 1, 128>}, {pipeline_mode = #tpu.pipeline_mode<synchronous>, transform_indices = @transform_4, window_bounds = array<i64: 8, 32>}]} {
    %c0 = arith.constant 0 : index
    %c0_0 = arith.constant 0 : index
    %0 = vector.load %arg3[%c0, %c0_0] : memref<32x128xf32, #tpu.memory_space<vmem>>, vector<32x128xf32>
    %c0_1 = arith.constant 0 : index
    %c0_2 = arith.constant 0 : index
    %1 = vector.load %arg1[%c0_1, %c0_2] : memref<64x16xf32, #tpu.memory_space<vmem>>, vector<64x16xf32>
    %c0_3 = arith.constant 0 : index
    %c0_4 = arith.constant 0 : index
    %2 = vector.load %arg2[%c0_3, %c0_4] : memref<16x128xf32, #tpu.memory_space<vmem>>, vector<16x128xf32>
    %cst = arith.constant dense<0.000000e+00> : vector<64x128xf32>
    %3 = tpu.matmul %1, %2, %cst {dimension_numbers = #tpu.dot_dimension_numbers<[1], [0], [0], [1], [0, 0, 1, 1], [], []>} : vector<64x16xf32>, vector<16x128xf32>, vector<64x128xf32> -> vector<64x128xf32>
    %c0_5 = arith.constant 0 : index
    %c0_6 = arith.constant 0 : index
    %4 = vector.load %arg4[%c0_5, %c0_6] : memref<1x128xf32, #tpu.memory_space<vmem>>, vector<1x128xf32>
    %5 = vector.shape_cast %4 : vector<1x128xf32> to vector<1x128xf32>
    %6 = vector.broadcast %5 : vector<1x128xf32> to vector<64x128xf32>
    %7 = arith.addf %3, %6 : vector<64x128xf32>
    %8 = tpu.iota {dimensions = array<i32: 1>} : vector<8x128xi32>
    %c64_i32 = arith.constant 64 : i32
    %9 = vector.broadcast %c64_i32 : i32 to vector<8x128xi32>
    %10 = arith.cmpi sge, %8, %9 : vector<8x128xi32>
    %c96_i32 = arith.constant 96 : i32
    %11 = vector.broadcast %c96_i32 : i32 to vector<8x128xi32>
    %12 = arith.cmpi slt, %8, %11 : vector<8x128xi32>
    %13 = arith.andi %10, %12 : vector<8x128xi1>
    %cst_7 = arith.constant 0.000000e+00 : f32
    %14 = vector.broadcast %cst_7 : f32 to vector<8x32xf32>
    %cst_8 = arith.constant 0.000000e+00 : f32
    %15 = vector.broadcast %cst_8 : f32 to vector<8x32xf32>
    %16 = vector.extract_strided_slice %7 {offsets = [0, 0], sizes = [8, 128], strides = [1, 1]} : vector<64x128xf32> to vector<8x128xf32>
    %cst_9 = arith.constant dense<0.000000e+00> : vector<8x128xf32>
    %17 = tpu.matmul %14, %0, %cst_9 {dimension_numbers = #tpu.dot_dimension_numbers<[1], [0], [0], [1], [0, 0, 1, 1], [], []>} : vector<8x32xf32>, vector<32x128xf32>, vector<8x128xf32> -> vector<8x128xf32>
    %18 = arith.addf %16, %17 : vector<8x128xf32>
    %cst_10 = arith.constant 5.000000e-01 : f32
    %19 = vector.broadcast %cst_10 : f32 to vector<8x128xf32>
    %20 = arith.mulf %19, %18 : vector<8x128xf32>
    %21 = arith.select %13, %18, %20 : vector<8x128xi1>, vector<8x128xf32>
    %22 = math.tanh %21 : vector<8x128xf32>
    %cst_11 = arith.constant 5.000000e-01 : f32
    %23 = vector.broadcast %cst_11 : f32 to vector<8x128xf32>
    %24 = arith.mulf %23, %22 : vector<8x128xf32>
    %cst_12 = arith.constant 5.000000e-01 : f32
    %25 = vector.broadcast %cst_12 : f32 to vector<8x128xf32>
    %26 = arith.addf %24, %25 : vector<8x128xf32>
    %27 = arith.select %13, %22, %26 : vector<8x128xi1>, vector<8x128xf32>
    %28 = vector.extract_strided_slice %27 {offsets = [0, 0], sizes = [8, 32], strides = [1, 1]} : vector<8x128xf32> to vector<8x32xf32>
    %29 = vector.extract_strided_slice %27 {offsets = [0, 32], sizes = [8, 32], strides = [1, 1]} : vector<8x128xf32> to vector<8x32xf32>
    %30 = vector.extract_strided_slice %27 {offsets = [0, 64], sizes = [8, 32], strides = [1, 1]} : vector<8x128xf32> to vector<8x32xf32>
    %31 = vector.extract_strided_slice %27 {offsets = [0, 96], sizes = [8, 32], strides = [1, 1]} : vector<8x128xf32> to vector<8x32xf32>
    %32 = arith.mulf %29, %15 : vector<8x32xf32>
    %33 = arith.mulf %28, %30 : vector<8x32xf32>
    %34 = arith.addf %32, %33 : vector<8x32xf32>
    %35 = math.tanh %34 : vector<8x32xf32>
    %36 = arith.mulf %31, %35 : vector<8x32xf32>
    %37 = vector.extract_strided_slice %7 {offsets = [8, 0], sizes = [8, 128], strides = [1, 1]} : vector<64x128xf32> to vector<8x128xf32>
    %cst_13 = arith.constant dense<0.000000e+00> : vector<8x128xf32>
    %38 = tpu.matmul %36, %0, %cst_13 {dimension_numbers = #tpu.dot_dimension_numbers<[1], [0], [0], [1], [0, 0, 1, 1], [], []>} : vector<8x32xf32>, vector<32x128xf32>, vector<8x128xf32> -> vector<8x128xf32>
    %39 = arith.addf %37, %38 : vector<8x128xf32>
    %cst_14 = arith.constant 5.000000e-01 : f32
    %40 = vector.broadcast %cst_14 : f32 to vector<8x128xf32>
    %41 = arith.mulf %40, %39 : vector<8x128xf32>
    %42 = arith.select %13, %39, %41 : vector<8x128xi1>, vector<8x128xf32>
    %43 = math.tanh %42 : vector<8x128xf32>
    %cst_15 = arith.constant 5.000000e-01 : f32
    %44 = vector.broadcast %cst_15 : f32 to vector<8x128xf32>
    %45 = arith.mulf %44, %43 : vector<8x128xf32>
    %cst_16 = arith.constant 5.000000e-01 : f32
    %46 = vector.broadcast %cst_16 : f32 to vector<8x128xf32>
    %47 = arith.addf %45, %46 : vector<8x128xf32>
    %48 = arith.select %13, %43, %47 : vector<8x128xi1>, vector<8x128xf32>
    %49 = vector.extract_strided_slice %48 {offsets = [0, 0], sizes = [8, 32], strides = [1, 1]} : vector<8x128xf32> to vector<8x32xf32>
    %50 = vector.extract_strided_slice %48 {offsets = [0, 32], sizes = [8, 32], strides = [1, 1]} : vector<8x128xf32> to vector<8x32xf32>
    %51 = vector.extract_strided_slice %48 {offsets = [0, 64], sizes = [8, 32], strides = [1, 1]} : vector<8x128xf32> to vector<8x32xf32>
    %52 = vector.extract_strided_slice %48 {offsets = [0, 96], sizes = [8, 32], strides = [1, 1]} : vector<8x128xf32> to vector<8x32xf32>
    %53 = arith.mulf %50, %34 : vector<8x32xf32>
    %54 = arith.mulf %49, %51 : vector<8x32xf32>
    %55 = arith.addf %53, %54 : vector<8x32xf32>
    %56 = math.tanh %55 : vector<8x32xf32>
    %57 = arith.mulf %52, %56 : vector<8x32xf32>
    %58 = vector.extract_strided_slice %7 {offsets = [16, 0], sizes = [8, 128], strides = [1, 1]} : vector<64x128xf32> to vector<8x128xf32>
    %cst_17 = arith.constant dense<0.000000e+00> : vector<8x128xf32>
    %59 = tpu.matmul %57, %0, %cst_17 {dimension_numbers = #tpu.dot_dimension_numbers<[1], [0], [0], [1], [0, 0, 1, 1], [], []>} : vector<8x32xf32>, vector<32x128xf32>, vector<8x128xf32> -> vector<8x128xf32>
    %60 = arith.addf %58, %59 : vector<8x128xf32>
    %cst_18 = arith.constant 5.000000e-01 : f32
    %61 = vector.broadcast %cst_18 : f32 to vector<8x128xf32>
    %62 = arith.mulf %61, %60 : vector<8x128xf32>
    %63 = arith.select %13, %60, %62 : vector<8x128xi1>, vector<8x128xf32>
    %64 = math.tanh %63 : vector<8x128xf32>
    %cst_19 = arith.constant 5.000000e-01 : f32
    %65 = vector.broadcast %cst_19 : f32 to vector<8x128xf32>
    %66 = arith.mulf %65, %64 : vector<8x128xf32>
    %cst_20 = arith.constant 5.000000e-01 : f32
    %67 = vector.broadcast %cst_20 : f32 to vector<8x128xf32>
    %68 = arith.addf %66, %67 : vector<8x128xf32>
    %69 = arith.select %13, %64, %68 : vector<8x128xi1>, vector<8x128xf32>
    %70 = vector.extract_strided_slice %69 {offsets = [0, 0], sizes = [8, 32], strides = [1, 1]} : vector<8x128xf32> to vector<8x32xf32>
    %71 = vector.extract_strided_slice %69 {offsets = [0, 32], sizes = [8, 32], strides = [1, 1]} : vector<8x128xf32> to vector<8x32xf32>
    %72 = vector.extract_strided_slice %69 {offsets = [0, 64], sizes = [8, 32], strides = [1, 1]} : vector<8x128xf32> to vector<8x32xf32>
    %73 = vector.extract_strided_slice %69 {offsets = [0, 96], sizes = [8, 32], strides = [1, 1]} : vector<8x128xf32> to vector<8x32xf32>
    %74 = arith.mulf %71, %55 : vector<8x32xf32>
    %75 = arith.mulf %70, %72 : vector<8x32xf32>
    %76 = arith.addf %74, %75 : vector<8x32xf32>
    %77 = math.tanh %76 : vector<8x32xf32>
    %78 = arith.mulf %73, %77 : vector<8x32xf32>
    %79 = vector.extract_strided_slice %7 {offsets = [24, 0], sizes = [8, 128], strides = [1, 1]} : vector<64x128xf32> to vector<8x128xf32>
    %cst_21 = arith.constant dense<0.000000e+00> : vector<8x128xf32>
    %80 = tpu.matmul %78, %0, %cst_21 {dimension_numbers = #tpu.dot_dimension_numbers<[1], [0], [0], [1], [0, 0, 1, 1], [], []>} : vector<8x32xf32>, vector<32x128xf32>, vector<8x128xf32> -> vector<8x128xf32>
    %81 = arith.addf %79, %80 : vector<8x128xf32>
    %cst_22 = arith.constant 5.000000e-01 : f32
    %82 = vector.broadcast %cst_22 : f32 to vector<8x128xf32>
    %83 = arith.mulf %82, %81 : vector<8x128xf32>
    %84 = arith.select %13, %81, %83 : vector<8x128xi1>, vector<8x128xf32>
    %85 = math.tanh %84 : vector<8x128xf32>
    %cst_23 = arith.constant 5.000000e-01 : f32
    %86 = vector.broadcast %cst_23 : f32 to vector<8x128xf32>
    %87 = arith.mulf %86, %85 : vector<8x128xf32>
    %cst_24 = arith.constant 5.000000e-01 : f32
    %88 = vector.broadcast %cst_24 : f32 to vector<8x128xf32>
    %89 = arith.addf %87, %88 : vector<8x128xf32>
    %90 = arith.select %13, %85, %89 : vector<8x128xi1>, vector<8x128xf32>
    %91 = vector.extract_strided_slice %90 {offsets = [0, 0], sizes = [8, 32], strides = [1, 1]} : vector<8x128xf32> to vector<8x32xf32>
    %92 = vector.extract_strided_slice %90 {offsets = [0, 32], sizes = [8, 32], strides = [1, 1]} : vector<8x128xf32> to vector<8x32xf32>
    %93 = vector.extract_strided_slice %90 {offsets = [0, 64], sizes = [8, 32], strides = [1, 1]} : vector<8x128xf32> to vector<8x32xf32>
    %94 = vector.extract_strided_slice %90 {offsets = [0, 96], sizes = [8, 32], strides = [1, 1]} : vector<8x128xf32> to vector<8x32xf32>
    %95 = arith.mulf %92, %76 : vector<8x32xf32>
    %96 = arith.mulf %91, %93 : vector<8x32xf32>
    %97 = arith.addf %95, %96 : vector<8x32xf32>
    %98 = math.tanh %97 : vector<8x32xf32>
    %99 = arith.mulf %94, %98 : vector<8x32xf32>
    %100 = vector.extract_strided_slice %7 {offsets = [32, 0], sizes = [8, 128], strides = [1, 1]} : vector<64x128xf32> to vector<8x128xf32>
    %cst_25 = arith.constant dense<0.000000e+00> : vector<8x128xf32>
    %101 = tpu.matmul %99, %0, %cst_25 {dimension_numbers = #tpu.dot_dimension_numbers<[1], [0], [0], [1], [0, 0, 1, 1], [], []>} : vector<8x32xf32>, vector<32x128xf32>, vector<8x128xf32> -> vector<8x128xf32>
    %102 = arith.addf %100, %101 : vector<8x128xf32>
    %cst_26 = arith.constant 5.000000e-01 : f32
    %103 = vector.broadcast %cst_26 : f32 to vector<8x128xf32>
    %104 = arith.mulf %103, %102 : vector<8x128xf32>
    %105 = arith.select %13, %102, %104 : vector<8x128xi1>, vector<8x128xf32>
    %106 = math.tanh %105 : vector<8x128xf32>
    %cst_27 = arith.constant 5.000000e-01 : f32
    %107 = vector.broadcast %cst_27 : f32 to vector<8x128xf32>
    %108 = arith.mulf %107, %106 : vector<8x128xf32>
    %cst_28 = arith.constant 5.000000e-01 : f32
    %109 = vector.broadcast %cst_28 : f32 to vector<8x128xf32>
    %110 = arith.addf %108, %109 : vector<8x128xf32>
    %111 = arith.select %13, %106, %110 : vector<8x128xi1>, vector<8x128xf32>
    %112 = vector.extract_strided_slice %111 {offsets = [0, 0], sizes = [8, 32], strides = [1, 1]} : vector<8x128xf32> to vector<8x32xf32>
    %113 = vector.extract_strided_slice %111 {offsets = [0, 32], sizes = [8, 32], strides = [1, 1]} : vector<8x128xf32> to vector<8x32xf32>
    %114 = vector.extract_strided_slice %111 {offsets = [0, 64], sizes = [8, 32], strides = [1, 1]} : vector<8x128xf32> to vector<8x32xf32>
    %115 = vector.extract_strided_slice %111 {offsets = [0, 96], sizes = [8, 32], strides = [1, 1]} : vector<8x128xf32> to vector<8x32xf32>
    %116 = arith.mulf %113, %97 : vector<8x32xf32>
    %117 = arith.mulf %112, %114 : vector<8x32xf32>
    %118 = arith.addf %116, %117 : vector<8x32xf32>
    %119 = math.tanh %118 : vector<8x32xf32>
    %120 = arith.mulf %115, %119 : vector<8x32xf32>
    %121 = vector.extract_strided_slice %7 {offsets = [40, 0], sizes = [8, 128], strides = [1, 1]} : vector<64x128xf32> to vector<8x128xf32>
    %cst_29 = arith.constant dense<0.000000e+00> : vector<8x128xf32>
    %122 = tpu.matmul %120, %0, %cst_29 {dimension_numbers = #tpu.dot_dimension_numbers<[1], [0], [0], [1], [0, 0, 1, 1], [], []>} : vector<8x32xf32>, vector<32x128xf32>, vector<8x128xf32> -> vector<8x128xf32>
    %123 = arith.addf %121, %122 : vector<8x128xf32>
    %cst_30 = arith.constant 5.000000e-01 : f32
    %124 = vector.broadcast %cst_30 : f32 to vector<8x128xf32>
    %125 = arith.mulf %124, %123 : vector<8x128xf32>
    %126 = arith.select %13, %123, %125 : vector<8x128xi1>, vector<8x128xf32>
    %127 = math.tanh %126 : vector<8x128xf32>
    %cst_31 = arith.constant 5.000000e-01 : f32
    %128 = vector.broadcast %cst_31 : f32 to vector<8x128xf32>
    %129 = arith.mulf %128, %127 : vector<8x128xf32>
    %cst_32 = arith.constant 5.000000e-01 : f32
    %130 = vector.broadcast %cst_32 : f32 to vector<8x128xf32>
    %131 = arith.addf %129, %130 : vector<8x128xf32>
    %132 = arith.select %13, %127, %131 : vector<8x128xi1>, vector<8x128xf32>
    %133 = vector.extract_strided_slice %132 {offsets = [0, 0], sizes = [8, 32], strides = [1, 1]} : vector<8x128xf32> to vector<8x32xf32>
    %134 = vector.extract_strided_slice %132 {offsets = [0, 32], sizes = [8, 32], strides = [1, 1]} : vector<8x128xf32> to vector<8x32xf32>
    %135 = vector.extract_strided_slice %132 {offsets = [0, 64], sizes = [8, 32], strides = [1, 1]} : vector<8x128xf32> to vector<8x32xf32>
    %136 = vector.extract_strided_slice %132 {offsets = [0, 96], sizes = [8, 32], strides = [1, 1]} : vector<8x128xf32> to vector<8x32xf32>
    %137 = arith.mulf %134, %118 : vector<8x32xf32>
    %138 = arith.mulf %133, %135 : vector<8x32xf32>
    %139 = arith.addf %137, %138 : vector<8x32xf32>
    %140 = math.tanh %139 : vector<8x32xf32>
    %141 = arith.mulf %136, %140 : vector<8x32xf32>
    %142 = vector.extract_strided_slice %7 {offsets = [48, 0], sizes = [8, 128], strides = [1, 1]} : vector<64x128xf32> to vector<8x128xf32>
    %cst_33 = arith.constant dense<0.000000e+00> : vector<8x128xf32>
    %143 = tpu.matmul %141, %0, %cst_33 {dimension_numbers = #tpu.dot_dimension_numbers<[1], [0], [0], [1], [0, 0, 1, 1], [], []>} : vector<8x32xf32>, vector<32x128xf32>, vector<8x128xf32> -> vector<8x128xf32>
    %144 = arith.addf %142, %143 : vector<8x128xf32>
    %cst_34 = arith.constant 5.000000e-01 : f32
    %145 = vector.broadcast %cst_34 : f32 to vector<8x128xf32>
    %146 = arith.mulf %145, %144 : vector<8x128xf32>
    %147 = arith.select %13, %144, %146 : vector<8x128xi1>, vector<8x128xf32>
    %148 = math.tanh %147 : vector<8x128xf32>
    %cst_35 = arith.constant 5.000000e-01 : f32
    %149 = vector.broadcast %cst_35 : f32 to vector<8x128xf32>
    %150 = arith.mulf %149, %148 : vector<8x128xf32>
    %cst_36 = arith.constant 5.000000e-01 : f32
    %151 = vector.broadcast %cst_36 : f32 to vector<8x128xf32>
    %152 = arith.addf %150, %151 : vector<8x128xf32>
    %153 = arith.select %13, %148, %152 : vector<8x128xi1>, vector<8x128xf32>
    %154 = vector.extract_strided_slice %153 {offsets = [0, 0], sizes = [8, 32], strides = [1, 1]} : vector<8x128xf32> to vector<8x32xf32>
    %155 = vector.extract_strided_slice %153 {offsets = [0, 32], sizes = [8, 32], strides = [1, 1]} : vector<8x128xf32> to vector<8x32xf32>
    %156 = vector.extract_strided_slice %153 {offsets = [0, 64], sizes = [8, 32], strides = [1, 1]} : vector<8x128xf32> to vector<8x32xf32>
    %157 = vector.extract_strided_slice %153 {offsets = [0, 96], sizes = [8, 32], strides = [1, 1]} : vector<8x128xf32> to vector<8x32xf32>
    %158 = arith.mulf %155, %139 : vector<8x32xf32>
    %159 = arith.mulf %154, %156 : vector<8x32xf32>
    %160 = arith.addf %158, %159 : vector<8x32xf32>
    %161 = math.tanh %160 : vector<8x32xf32>
    %162 = arith.mulf %157, %161 : vector<8x32xf32>
    %163 = vector.extract_strided_slice %7 {offsets = [56, 0], sizes = [8, 128], strides = [1, 1]} : vector<64x128xf32> to vector<8x128xf32>
    %cst_37 = arith.constant dense<0.000000e+00> : vector<8x128xf32>
    %164 = tpu.matmul %162, %0, %cst_37 {dimension_numbers = #tpu.dot_dimension_numbers<[1], [0], [0], [1], [0, 0, 1, 1], [], []>} : vector<8x32xf32>, vector<32x128xf32>, vector<8x128xf32> -> vector<8x128xf32>
    %165 = arith.addf %163, %164 : vector<8x128xf32>
    %cst_38 = arith.constant 5.000000e-01 : f32
    %166 = vector.broadcast %cst_38 : f32 to vector<8x128xf32>
    %167 = arith.mulf %166, %165 : vector<8x128xf32>
    %168 = arith.select %13, %165, %167 : vector<8x128xi1>, vector<8x128xf32>
    %169 = math.tanh %168 : vector<8x128xf32>
    %cst_39 = arith.constant 5.000000e-01 : f32
    %170 = vector.broadcast %cst_39 : f32 to vector<8x128xf32>
    %171 = arith.mulf %170, %169 : vector<8x128xf32>
    %cst_40 = arith.constant 5.000000e-01 : f32
    %172 = vector.broadcast %cst_40 : f32 to vector<8x128xf32>
    %173 = arith.addf %171, %172 : vector<8x128xf32>
    %174 = arith.select %13, %169, %173 : vector<8x128xi1>, vector<8x128xf32>
    %175 = vector.extract_strided_slice %174 {offsets = [0, 0], sizes = [8, 32], strides = [1, 1]} : vector<8x128xf32> to vector<8x32xf32>
    %176 = vector.extract_strided_slice %174 {offsets = [0, 32], sizes = [8, 32], strides = [1, 1]} : vector<8x128xf32> to vector<8x32xf32>
    %177 = vector.extract_strided_slice %174 {offsets = [0, 64], sizes = [8, 32], strides = [1, 1]} : vector<8x128xf32> to vector<8x32xf32>
    %178 = vector.extract_strided_slice %174 {offsets = [0, 96], sizes = [8, 32], strides = [1, 1]} : vector<8x128xf32> to vector<8x32xf32>
    %179 = arith.mulf %176, %160 : vector<8x32xf32>
    %180 = arith.mulf %175, %177 : vector<8x32xf32>
    %181 = arith.addf %179, %180 : vector<8x32xf32>
    %182 = math.tanh %181 : vector<8x32xf32>
    %183 = arith.mulf %178, %182 : vector<8x32xf32>
    %cst_41 = arith.constant 0.000000e+00 : f32
    %184 = vector.broadcast %cst_41 : f32 to vector<8x32xf32>
    %185 = arith.maximumf %183, %184 : vector<8x32xf32>
    %c0_42 = arith.constant 0 : index
    %c0_43 = arith.constant 0 : index
    %186 = vector.load %arg5[%c0_42, %c0_43] : memref<8x32xf32, #tpu.memory_space<vmem>>, vector<8x32xf32>
    tpu.vector_store %arg5[%c0_42, %c0_43], %185 {strides = array<i32>} : memref<8x32xf32, #tpu.memory_space<vmem>>, vector<8x32xf32>,
    return
  }
  func.func @transform_0(%arg0: i32) -> (i32, i32) {
    %c0_i32 = arith.constant 0 : i32
    %c0_i32_0 = arith.constant 0 : i32
    %c0_i32_1 = arith.constant 0 : i32
    return %c0_i32, %c0_i32_0 : i32, i32
  }
  func.func @transform_1(%arg0: i32) -> (i32, i32) {
    %c0_i32 = arith.constant 0 : i32
    %c0_i32_0 = arith.constant 0 : i32
    %c0_i32_1 = arith.constant 0 : i32
    return %c0_i32, %c0_i32_0 : i32, i32
  }
  func.func @transform_2(%arg0: i32) -> (i32, i32) {
    %c0_i32 = arith.constant 0 : i32
    %c0_i32_0 = arith.constant 0 : i32
    %c0_i32_1 = arith.constant 0 : i32
    return %c0_i32, %c0_i32_0 : i32, i32
  }
  func.func @transform_3(%arg0: i32) -> (i32, i32) {
    %c0_i32 = arith.constant 0 : i32
    %c0_i32_0 = arith.constant 0 : i32
    %c0_i32_1 = arith.constant 0 : i32
    return %c0_i32, %c0_i32_0 : i32, i32
  }
  func.func @transform_4(%arg0: i32) -> (i32, i32) {
    %c0_i32 = arith.constant 0 : i32
    %c0_i32_0 = arith.constant 0 : i32
    %c0_i32_1 = arith.constant 0 : i32
    return %c0_i32, %c0_i32_0 : i32, i32
  }
}

</mosaic_0001>

<bundles_post_ra>
// kernel: tpu_custom_call.1
= control target key start
LH: loop header
LB: loop body
LE: loop exit
PB: predicated region body
PF: predicated region fallthrough
CT: control target
= control target key end

     0   :  { %vm39_vm0 = vcmask 130048   ;;  %v1269_v3 = vmov 0.0|0.0   ;;  %vm1270_vm1 = vmmov 0   ;;  %v1271_v10 = vmov 0.0   ;;  %s1516_s0 = inlined_call_operand.vmem [shape: f32[64,16], index: 0, kind: input, shape index: {}]   ;;  %s1517_s1 = inlined_call_operand.vmem [shape: f32[16,128], index: 1, kind: input, shape index: {}]   ;;  %s1518_s2 = inlined_call_operand.vmem [shape: f32[32,128], index: 2, kind: input, shape index: {}]   ;;  %s1519_s3 = inlined_call_operand.vmem [shape: f32[1,128], index: 3, kind: input, shape index: {}]   ;;  %s1520_s4 = inlined_call_operand.hbm [shape: f32[8,32], index: 4, kind: output, shape index: {}]  }
   0x1   :  { %v30_v0 = vld [vmem:[%s1517_s1] sm:$0xff]  ;;  %v31_v1 = vld [vmem:[%s1517_s1 + $0x8] sm:$0xff]  ;;  %1159 = vmatprep.subr.bf16.mxu1 %v1269_v3  ;;  %v20_v8 = vld [vmem:[%s1518_s2 + $0x10] sm:$0xff]  ;;  %1075 = vmatprep.mubr.msk.f32.mxu1 %vm1270_vm1, %v1271_v10 }
   0x2   :  { %v18_v2 = vld [vmem:[%s1518_s2] sm:$0xff]  ;;  %v1155_v4 = vpack.c.bf16 %v31_v1, %v30_v0  ;;  %v19_v5 = vld [vmem:[%s1518_s2 + $0x8] sm:$0xff]  ;;  %v21_v9 = vld [vmem:[%s1518_s2 + $0x18] sm:$0xff] }
   0x3   :  { %v22_v6 = vld [vmem:[%s1516_s0] sm:$0xff]  ;;  %v1316_v7 = vpack.c.bf16 %v19_v5, %v18_v2 }
   0x4   :  { %1055 = vmatprep.mubr.msk.f32.mxu0 %vm39_vm0, %v22_v6 }
   0x5   :  { %9 = vsyncpa [#allocation3], 0  ;;  %1156 = vmatprep.subr.bf16.mxu0 %v1155_v4  ;;  %1161 = vmatpush3.bf16.msra.mxu1 %v1316_v7  ;;  %v23_v11 = vld [vmem:[%s1516_s0 + $0x8] sm:$0xff]  ;;  %v1331_v12 = vpack.c.bf16 %v21_v9, %v20_v8  ;;  %v169_v13 = vlaneseq  ;;  %v1352_v14 = vld [vmem:[%s1519_s3] ss:$0 sm:$0xff]  ;;  %s1272_s3 = smov 64  }
   0x6   :  { %1158 = vmatpush3.bf16.msra.mxu0 %v1155_v4  ;;  %1162 = vmatprep.subr.bf16.mxu1 %v1269_v3  ;;  %s1273_s5 = smov 32   ;;  %vm174_vm5 = vcmask 261120   ;;  %v24_v53 = vld [vmem:[%s1516_s0 + $0x10] sm:$0xff]  ;;  %v25_v54 = vld [vmem:[%s1516_s0 + $0x18] sm:$0xff]  ;;  %v26_v55 = vld [vmem:[%s1516_s0 + $0x20] sm:$0xff] }
   0x7   :  { %1171 = vmatprep.subr.bf16.mxu0 %v1269_v3  ;;  %v170_v15 = vand.u32 127, %v169_v13  ;;  %v27_v56 = vld [vmem:[%s1516_s0 + $0x28] sm:$0xff]  ;;  %v28_v57 = vld [vmem:[%s1516_s0 + $0x30] sm:$0xff]  ;;  %v29_v58 = vld [vmem:[%s1516_s0 + $0x38] sm:$0xff]  ;;  %s1274_s0 = smov [#allocation2]  }
   0x8   :  { %s977_s18 = sshll.u32 %s1274_s0, 4  ;;  %s978_s18 = int_to_ptr.vmem [resolvable:$true] %s977_s18 }
   0x9   :  { %1056 = vmatmul.mubr.msk.f32.vlgmr.msra.gmra.mrb[0].mxu0 %vm39_vm0, %v23_v11  ;;  %1164 = vmatpush3.bf16.msra.mxu1 %v1331_v12  ;;  %vm171_vm2 = vcmp.ge.s32.totalorder %v170_v15, 64  ;;  %vm172_vm3 = vcmp.lt.s32.totalorder %v170_v15, 96  ;;  %s1245_s19 = scalar_lea.vmem %s978_s18, 128  ;;  %p1250_p1 = scmp.lt.s32.totalorder %s978_s18, %s978_s18 }
   0xa   :  { %1173 = vmatpush3.bf16.msra.mxu0 %v1316_v7  ;;  %1165 = vmatprep.subr.bf16.mxu1 %v1269_v3  ;;  %vm1355_vm4 = vmand %vm171_vm2, %vm172_vm3  ;;  %p1246_p0 = scmp.ne.s32.totalorder %s978_s18, %s1245_s19  ;;  %p1251_p2 = scmp.lt.s32.totalorder %s1245_s19, %s1245_s19 }
   0xb   :  { %1174 = vmatprep.subr.bf16.mxu0 %v1269_v3  ;;  %1058 = vmatprep.mubr.msk.f32.mxu0 %vm39_vm0, %v24_v53 }
   0xc   :  { %1076 = vmatmul.mubr.f32.vlgmr.msra.gmra.mrb[0].mxu1 %v1271_v10  ;;  %p1252_p3 = por %p1251_p2, %p1250_p1 }
   0xd   :  { %1167 = vmatpush3.bf16.msra.mxu1 %v1316_v7  ;;  %1086 = vmatprep.mubr.msk.f32.mxu1 %vm1270_vm1, %v1271_v10 }
   0xe   :  { %1168 = vmatprep.subr.bf16.mxu1 %v1269_v3  ;;  %1176 = vmatpush3.bf16.msra.mxu0 %v1331_v12  ;;  %p1253_p4 = pnand %p1252_p3, %p1246_p0 }
   0xf   :  { %1183 = vmatprep.subr.bf16.mxu0 %v1269_v3  ;;  %1059 = vmatmul.mubr.msk.f32.gmra.mrb[2].mxu0 %vm39_vm0, %v25_v54 }
  0x10   :  { %1061 = vmatprep.mubr.msk.f32.mxu0 %vm39_vm0, %v26_v55 }
  0x11   :  { %1170 = vmatpush3.bf16.msra.mxu1 %v1331_v12 }
  0x12   :  { %1177 = vmatprep.subr.bf16.mxu1 %v1269_v3 }
  0x13   :  { %1062 = vmatmul.mubr.msk.f32.gmra.mrb[4].mxu0 %vm39_vm0, %v27_v56 }
  0x14   :  { %1064 = vmatprep.mubr.msk.f32.mxu0 %vm39_vm0, %v28_v57 }
  0x17   :  { %1065 = vmatmul.mubr.msk.f32.gmra.mrb[6].mxu0 %vm39_vm0, %v29_v58 }
  0x18   :  { %1097 = vmatprep.mubr.msk.f32.mxu0 %vm1270_vm1, %v1271_v10 }
  0xdc   :  { %v1057_v16 = vpop.f32.mrb[0].mxu0 }
  0xdd   :  { %v130_v17 = vpop.f32.mrb[1].mxu0  ;;  %v136_v38 = vadd.f32 %v1057_v16, %v1352_v14 }
  0xde   :  { %v131_v18 = vadd.f32 %v1352_v14, %v130_v17 }
  0xdf   :  { %v244_v19 = vpop.f32.mrb[0].mxu1 }
  0xe0   :  { %v248_v20 = vadd.f32 %v244_v19, %v131_v18  ;;  %v1077_v21 = vpop.f32.mrb[1].mxu1 }
  0xe2   :  { %v249_v23 = vmul.f32 0.5, %v248_v20  ;;  %v1060_v62 = vpop.f32.mrb[2].mxu0 }
  0xe3   :  { %v140_v63 = vpop.f32.mrb[3].mxu0 }
  0xe4   :  { %v250_v24 = vsel %vm1355_vm4, %v248_v20, %v249_v23  ;;  %v141_v6 = vadd.f32 %v1352_v14, %v140_v63 }
  0xe5   :  { %1213 = vtanh.f32 %v250_v24 }
  0xe6   :  { %v1409_v0 = vpop.f32.mrb[4].mxu0 }
  0xe7   :  { %v1411_v1 = vpop.f32.mrb[5].mxu0 }
  0xea   :  { %v1413_v2 = vpop.f32.mrb[6].mxu0 }
  0xeb   :  { %v1415_v4 = vpop.f32.mrb[7].mxu0 }
  0xef   :  { %v1214_v25 = vpop.eup %1213 }
  0xf0   :  { %v252_v26 = vmul.f32 0.5, %v1214_v25 }
  0xf2   :  { %v253_v27 = vadd.f32 0.5, %v252_v26 }
  0xf4   :  { %v254_v28 = vsel %vm1355_vm4, %v1214_v25, %v253_v27 }
  0xf5   :  { %257 = vrot.lane.b32.xlu0 %v254_v28, %s1272_s3  ;;  %v255_v31 = vmul.f32 0.0, %v254_v28 }
 0x167   :  { %v258_v29 = vpop.permute.xlu0 %257 }
 0x168   :  { %v260_v30 = vmul.f32 %v258_v29, %v254_v28 }
 0x16a   :  { %262 = vrot.lane.b32.xlu0 %v260_v30, %s1273_s5  ;;  %v146_v30 = vadd.f32 %v1060_v62, %v1352_v14 }
 0x1dc   :  { %v263_v32 = vpop.permute.xlu0 %262 }
 0x1dd   :  { %v265_v33 = vadd.f32 %v263_v32, %v255_v31 }
 0x1df   :  { %1215 = vtanh.f32 %v265_v33 }
 0x1e9   :  { %v1216_v34 = vpop.eup %1215 }
 0x1ea   :  { %268 = vrot.lane.b32.xlu1 %v1216_v34, %s1272_s3 }
 0x25c   :  { %v269_v35 = vpop.permute.xlu1 %268 }
 0x25d   :  { %v271_v36 = vmul.f32 %v269_v35, %v254_v28 }
 0x25f   :  { %273 = vrot.lane.b32.xlu1 %v271_v36, %s1273_s5 }
 0x2d1   :  { %v274_v37 = vpop.permute.xlu1 %273 }
 0x2d2   :  { %1087 = vmatmul.mubr.msk.f32.vlgmr.msra.gmra.mrb[2].mxu1 %vm174_vm5, %v274_v37 }
 0x2d3   :  { %1179 = vmatpush3.bf16.msra.mxu1 %v1316_v7  ;;  %1108 = vmatprep.mubr.msk.f32.mxu1 %vm1270_vm1, %v1271_v10 }
 0x2d4   :  { %1180 = vmatprep.subr.bf16.mxu1 %v1269_v3 }
 0x2d7   :  { %1182 = vmatpush3.bf16.msra.mxu1 %v1331_v12 }
 0x2d8   :  { %1189 = vmatprep.subr.bf16.mxu1 %v1269_v3 }
 0x3a5   :  { %v343_v39 = vpop.f32.mrb[2].mxu1 }
 0x3a6   :  { %v347_v40 = vadd.f32 %v343_v39, %v136_v38  ;;  %v1088_v41 = vpop.f32.mrb[3].mxu1 }
 0x3a8   :  { %v348_v42 = vmul.f32 0.5, %v347_v40 }
 0x3aa   :  { %v349_v43 = vsel %vm1355_vm4, %v347_v40, %v348_v42 }
 0x3ab   :  { %1217 = vtanh.f32 %v349_v43 }
 0x3b5   :  { %v1218_v44 = vpop.eup %1217 }
 0x3b6   :  { %v351_v45 = vmul.f32 0.5, %v1218_v44 }
 0x3b8   :  { %v352_v46 = vadd.f32 0.5, %v351_v45 }
 0x3ba   :  { %v353_v47 = vsel %vm1355_vm4, %v1218_v44, %v352_v46 }
 0x3bb   :  { %356 = vrot.lane.b32.xlu0 %v353_v47, %s1272_s3  ;;  %v354_v50 = vmul.f32 %v353_v47, %v265_v33 }
 0x42d   :  { %v357_v48 = vpop.permute.xlu0 %356 }
 0x42e   :  { %v359_v49 = vmul.f32 %v357_v48, %v353_v47 }
 0x430   :  { %361 = vrot.lane.b32.xlu1 %v359_v49, %s1273_s5  ;;  %v151_v49 = vadd.f32 %v1352_v14, %v1411_v1 }
 0x4a2   :  { %v362_v51 = vpop.permute.xlu1 %361 }
 0x4a3   :  { %v364_v52 = vadd.f32 %v362_v51, %v354_v50 }
 0x4a5   :  { %1219 = vtanh.f32 %v364_v52 }
 0x4af   :  { %v1220_v59 = vpop.eup %1219 }
 0x4b0   :  { %367 = vrot.lane.b32.xlu0 %v1220_v59, %s1272_s3 }
 0x522   :  { %v368_v60 = vpop.permute.xlu0 %367 }
 0x523   :  { %v370_v61 = vmul.f32 %v368_v60, %v353_v47 }
 0x525   :  { %372 = vrot.lane.b32.xlu1 %v370_v61, %s1273_s5 }
 0x597   :  { %v373_v5 = vpop.permute.xlu1 %372 }
 0x598   :  { %1098 = vmatmul.mubr.msk.f32.vlgmr.msra.gmra.mrb[8].mxu0 %vm174_vm5, %v373_v5 }
 0x599   :  { %1185 = vmatpush3.bf16.msra.mxu0 %v1316_v7  ;;  %1119 = vmatprep.mubr.msk.f32.mxu0 %vm1270_vm1, %v1271_v10 }
 0x59a   :  { %1186 = vmatprep.subr.bf16.mxu0 %v1269_v3 }
 0x59d   :  { %1188 = vmatpush3.bf16.msra.mxu0 %v1331_v12 }
 0x59e   :  { %1195 = vmatprep.subr.bf16.mxu0 %v1269_v3 }
 0x66b   :  { %v442_v8 = vpop.f32.mrb[8].mxu0 }
 0x66c   :  { %v446_v9 = vadd.f32 %v442_v8, %v141_v6  ;;  %v1099_v11 = vpop.f32.mrb[9].mxu0 }
 0x66e   :  { %v447_v13 = vmul.f32 0.5, %v446_v9 }
 0x670   :  { %v448_v15 = vsel %vm1355_vm4, %v446_v9, %v447_v13  ;;  %v156_v9 = vadd.f32 %v1409_v0, %v1352_v14 }
 0x671   :  { %1221 = vtanh.f32 %v448_v15 }
 0x67b   :  { %v1222_v16 = vpop.eup %1221 }
 0x67c   :  { %v450_v17 = vmul.f32 0.5, %v1222_v16 }
 0x67e   :  { %v451_v18 = vadd.f32 0.5, %v450_v17 }
 0x680   :  { %v452_v19 = vsel %vm1355_vm4, %v1222_v16, %v451_v18 }
 0x681   :  { %455 = vrot.lane.b32.xlu0 %v452_v19, %s1272_s3  ;;  %v453_v23 = vmul.f32 %v452_v19, %v364_v52 }
 0x6f3   :  { %v456_v20 = vpop.permute.xlu0 %455 }
 0x6f4   :  { %v458_v21 = vmul.f32 %v456_v20, %v452_v19 }
 0x6f6   :  { %460 = vrot.lane.b32.xlu1 %v458_v21, %s1273_s5 }
 0x768   :  { %v461_v24 = vpop.permute.xlu1 %460 }
 0x769   :  { %v463_v25 = vadd.f32 %v461_v24, %v453_v23 }
 0x76b   :  { %1223 = vtanh.f32 %v463_v25 }
 0x775   :  { %v1224_v26 = vpop.eup %1223 }
 0x776   :  { %466 = vrot.lane.b32.xlu0 %v1224_v26, %s1272_s3 }
 0x7e8   :  { %v467_v27 = vpop.permute.xlu0 %466 }
 0x7e9   :  { %v469_v28 = vmul.f32 %v467_v27, %v452_v19  ;;  %v161_v27 = vadd.f32 %v1352_v14, %v1415_v4 }
 0x7eb   :  { %471 = vrot.lane.b32.xlu1 %v469_v28, %s1273_s5 }
 0x85d   :  { %v472_v29 = vpop.permute.xlu1 %471 }
 0x85e   :  { %1109 = vmatmul.mubr.msk.f32.vlgmr.msra.gmra.mrb[4].mxu1 %vm174_vm5, %v472_v29 }
 0x85f   :  { %1191 = vmatpush3.bf16.msra.mxu1 %v1316_v7  ;;  %1130 = vmatprep.mubr.msk.f32.mxu1 %vm1270_vm1, %v1271_v10 }
 0x860   :  { %1192 = vmatprep.subr.bf16.mxu1 %v1269_v3 }
 0x863   :  { %1194 = vmatpush3.bf16.msra.mxu1 %v1331_v12 }
 0x864   :  { %1201 = vmatprep.subr.bf16.mxu1 %v1269_v3 }
 0x931   :  { %v541_v31 = vpop.f32.mrb[4].mxu1 }
 0x932   :  { %v545_v32 = vadd.f32 %v541_v31, %v146_v30  ;;  %v1110_v33 = vpop.f32.mrb[5].mxu1 }
 0x934   :  { %v546_v34 = vmul.f32 0.5, %v545_v32 }
 0x936   :  { %v547_v35 = vsel %vm1355_vm4, %v545_v32, %v546_v34 }
 0x937   :  { %1225 = vtanh.f32 %v547_v35 }
 0x941   :  { %v1226_v36 = vpop.eup %1225 }
 0x942   :  { %v549_v37 = vmul.f32 0.5, %v1226_v36 }
 0x944   :  { %v550_v38 = vadd.f32 0.5, %v549_v37 }
 0x946   :  { %v551_v39 = vsel %vm1355_vm4, %v1226_v36, %v550_v38 }
 0x947   :  { %554 = vrot.lane.b32.xlu0 %v551_v39, %s1272_s3  ;;  %v552_v42 = vmul.f32 %v551_v39, %v463_v25 }
 0x9b9   :  { %v555_v40 = vpop.permute.xlu0 %554 }
 0x9ba   :  { %v557_v41 = vmul.f32 %v555_v40, %v551_v39 }
 0x9bc   :  { %559 = vrot.lane.b32.xlu1 %v557_v41, %s1273_s5 }
 0xa2e   :  { %v560_v43 = vpop.permute.xlu1 %559 }
 0xa2f   :  { %v562_v44 = vadd.f32 %v560_v43, %v552_v42 }
 0xa31   :  { %1227 = vtanh.f32 %v562_v44 }
 0xa3b   :  { %v1228_v45 = vpop.eup %1227 }
 0xa3c   :  { %565 = vrot.lane.b32.xlu0 %v1228_v45, %s1272_s3  ;;  %v166_v45 = vadd.f32 %v1413_v2, %v1352_v14 }
 0xaae   :  { %v566_v46 = vpop.permute.xlu0 %565 }
 0xaaf   :  { %v568_v47 = vmul.f32 %v566_v46, %v551_v39 }
 0xab1   :  { %570 = vrot.lane.b32.xlu1 %v568_v47, %s1273_s5 }
 0xb23   :  { %v571_v48 = vpop.permute.xlu1 %570 }
 0xb24   :  { %1120 = vmatmul.mubr.msk.f32.vlgmr.msra.gmra.mrb[10].mxu0 %vm174_vm5, %v571_v48 }
 0xb25   :  { %1197 = vmatpush3.bf16.msra.mxu0 %v1316_v7  ;;  %1141 = vmatprep.mubr.msk.f32.mxu0 %vm1270_vm1, %v1271_v10 }
 0xb26   :  { %1198 = vmatprep.subr.bf16.mxu0 %v1269_v3 }
 0xb29   :  { %1200 = vmatpush3.bf16.msra.mxu0 %v1331_v12 }
 0xbf7   :  { %v640_v50 = vpop.f32.mrb[10].mxu0 }
 0xbf8   :  { %v644_v51 = vadd.f32 %v640_v50, %v151_v49  ;;  %v1121_v52 = vpop.f32.mrb[11].mxu0 }
 0xbfa   :  { %v645_v53 = vmul.f32 0.5, %v644_v51 }
 0xbfc   :  { %v646_v54 = vsel %vm1355_vm4, %v644_v51, %v645_v53 }
 0xbfd   :  { %1229 = vtanh.f32 %v646_v54 }
 0xc07   :  { %v1230_v55 = vpop.eup %1229 }
 0xc08   :  { %v648_v56 = vmul.f32 0.5, %v1230_v55 }
 0xc0a   :  { %v649_v57 = vadd.f32 0.5, %v648_v56 }
 0xc0c   :  { %v650_v58 = vsel %vm1355_vm4, %v1230_v55, %v649_v57 }
 0xc0d   :  { %653 = vrot.lane.b32.xlu0 %v650_v58, %s1272_s3  ;;  %v651_v61 = vmul.f32 %v650_v58, %v562_v44 }
 0xc7f   :  { %v654_v59 = vpop.permute.xlu0 %653 }
 0xc80   :  { %v656_v60 = vmul.f32 %v654_v59, %v650_v58 }
 0xc82   :  { %658 = vrot.lane.b32.xlu1 %v656_v60, %s1273_s5 }
 0xcf4   :  { %v659_v62 = vpop.permute.xlu1 %658 }
 0xcf5   :  { %v661_v63 = vadd.f32 %v659_v62, %v651_v61 }
 0xcf7   :  { %1231 = vtanh.f32 %v661_v63 }
 0xd01   :  { %v1232_v1 = vpop.eup %1231 }
 0xd02   :  { %664 = vrot.lane.b32.xlu0 %v1232_v1, %s1272_s3 }
 0xd74   :  { %v665_v5 = vpop.permute.xlu0 %664 }
 0xd75   :  { %v667_v6 = vmul.f32 %v665_v5, %v650_v58 }
 0xd77   :  { %669 = vrot.lane.b32.xlu1 %v667_v6, %s1273_s5 }
 0xde9   :  { %v670_v8 = vpop.permute.xlu1 %669 }
 0xdea   :  { %1131 = vmatmul.mubr.msk.f32.vlgmr.msra.gmra.mrb[6].mxu1 %vm174_vm5, %v670_v8 }
 0xdeb   :  { %1203 = vmatpush3.bf16.msra.mxu1 %v1316_v7  ;;  %1152 = vmatprep.mubr.msk.f32.mxu1 %vm1270_vm1, %v1271_v10 }
 0xdec   :  { %1204 = vmatprep.subr.bf16.mxu1 %v1269_v3 }
 0xdef   :  { %1206 = vmatpush3.bf16.msra.mxu1 %v1331_v12 }
 0xebd   :  { %v739_v11 = vpop.f32.mrb[6].mxu1 }
 0xebe   :  { %v743_v13 = vadd.f32 %v739_v11, %v156_v9  ;;  %v1132_v15 = vpop.f32.mrb[7].mxu1 }
 0xec0   :  { %v744_v16 = vmul.f32 0.5, %v743_v13 }
 0xec2   :  { %v745_v17 = vsel %vm1355_vm4, %v743_v13, %v744_v16 }
 0xec3   :  { %1233 = vtanh.f32 %v745_v17 }
 0xecd   :  { %v1234_v18 = vpop.eup %1233 }
 0xece   :  { %v747_v7 = vmul.f32 0.5, %v1234_v18 }
 0xed0   :  { %v748_v19 = vadd.f32 0.5, %v747_v7 }
 0xed2   :  { %v749_v10 = vsel %vm1355_vm4, %v1234_v18, %v748_v19 }
 0xed3   :  { %752 = vrot.lane.b32.xlu0 %v749_v10, %s1272_s3  ;;  %v750_v0 = vmul.f32 %v749_v10, %v661_v63 }
 0xf45   :  { %v753_v3 = vpop.permute.xlu0 %752 }
 0xf46   :  { %v755_v12 = vmul.f32 %v753_v3, %v749_v10 }
 0xf48   :  { %757 = vrot.lane.b32.xlu1 %v755_v12, %s1273_s5 }
 0xfba   :  { %v758_v20 = vpop.permute.xlu1 %757 }
 0xfbb   :  { %v760_v21 = vadd.f32 %v758_v20, %v750_v0 }
 0xfbd   :  { %1235 = vtanh.f32 %v760_v21 }
 0xfc7   :  { %v1236_v23 = vpop.eup %1235 }
 0xfc8   :  { %763 = vrot.lane.b32.xlu0 %v1236_v23, %s1272_s3 }
0x103a   :  { %v764_v24 = vpop.permute.xlu0 %763 }
0x103b   :  { %v766_v25 = vmul.f32 %v764_v24, %v749_v10 }
0x103d   :  { %768 = vrot.lane.b32.xlu1 %v766_v25, %s1273_s5 }
0x10af   :  { %v769_v26 = vpop.permute.xlu1 %768 }
0x10b0   :  { %1142 = vmatmul.mubr.msk.f32.vlgmr.msra.gmra.mrb[12].mxu0 %vm174_vm5, %v769_v26 }
0x1183   :  { %v838_v28 = vpop.f32.mrb[12].mxu0 }
0x1184   :  { %v842_v29 = vadd.f32 %v838_v28, %v161_v27  ;;  %v1143_v30 = vpop.f32.mrb[13].mxu0 }
0x1186   :  { %v843_v31 = vmul.f32 0.5, %v842_v29 }
0x1188   :  { %v844_v32 = vsel %vm1355_vm4, %v842_v29, %v843_v31 }
0x1189   :  { %1237 = vtanh.f32 %v844_v32 }
0x1193   :  { %v1238_v33 = vpop.eup %1237 }
0x1194   :  { %v846_v34 = vmul.f32 0.5, %v1238_v33 }
0x1196   :  { %v847_v35 = vadd.f32 0.5, %v846_v34 }
0x1198   :  { %v848_v36 = vsel %vm1355_vm4, %v1238_v33, %v847_v35 }
0x1199   :  { %851 = vrot.lane.b32.xlu0 %v848_v36, %s1272_s3  ;;  %v849_v4 = vmul.f32 %v848_v36, %v760_v21 }
0x120b   :  { %v852_v37 = vpop.permute.xlu0 %851 }
0x120c   :  { %v854_v38 = vmul.f32 %v852_v37, %v848_v36 }
0x120e   :  { %856 = vrot.lane.b32.xlu1 %v854_v38, %s1273_s5 }
0x1280   :  { %v857_v39 = vpop.permute.xlu1 %856 }
0x1281   :  { %v859_v40 = vadd.f32 %v857_v39, %v849_v4 }
0x1283   :  { %1239 = vtanh.f32 %v859_v40 }
0x128d   :  { %v1240_v41 = vpop.eup %1239 }
0x128e   :  { %862 = vrot.lane.b32.xlu0 %v1240_v41, %s1272_s3 }
0x1300   :  { %v863_v42 = vpop.permute.xlu0 %862 }
0x1301   :  { %v865_v43 = vmul.f32 %v863_v42, %v848_v36 }
0x1303   :  { %867 = vrot.lane.b32.xlu1 %v865_v43, %s1273_s5 }
0x1375   :  { %v868_v44 = vpop.permute.xlu1 %867 }
0x1376   :  { %1153 = vmatmul.mubr.msk.f32.vlgmr.msra.gmra.mrb[8].mxu1 %vm174_vm5, %v868_v44 }
0x1449   :  { %v937_v46 = vpop.f32.mrb[8].mxu1 }
0x144a   :  { %v941_v47 = vadd.f32 %v937_v46, %v166_v45  ;;  %v1154_v48 = vpop.f32.mrb[9].mxu1 }
0x144c   :  { %v942_v49 = vmul.f32 0.5, %v941_v47 }
0x144e   :  { %v943_v50 = vsel %vm1355_vm4, %v941_v47, %v942_v49 }
0x144f   :  { %1241 = vtanh.f32 %v943_v50 }
0x1459   :  { %v1242_v51 = vpop.eup %1241 }
0x145a   :  { %v945_v52 = vmul.f32 0.5, %v1242_v51 }
0x145c   :  { %v946_v53 = vadd.f32 0.5, %v945_v52 }
0x145e   :  { %v947_v54 = vsel %vm1355_vm4, %v1242_v51, %v946_v53 }
0x145f   :  { %950 = vrot.lane.b32.xlu0 %v947_v54, %s1272_s3  ;;  %v948_v14 = vmul.f32 %v947_v54, %v859_v40 }
0x14d1   :  { %v951_v55 = vpop.permute.xlu0 %950 }
0x14d2   :  { %v953_v56 = vmul.f32 %v951_v55, %v947_v54 }
0x14d4   :  { %955 = vrot.lane.b32.xlu1 %v953_v56, %s1273_s5 }
0x1546   :  { %v956_v2 = vpop.permute.xlu1 %955 }
0x1547   :  { %v958_v57 = vadd.f32 %v956_v2, %v948_v14 }
0x1549   :  { %1243 = vtanh.f32 %v958_v57 }
0x1553   :  { %v1244_v58 = vpop.eup %1243 }
0x1554   :  { %961 = vrot.lane.b32.xlu0 %v1244_v58, %s1272_s3 }
0x15c6   :  { %v962_v59 = vpop.permute.xlu0 %961 }
0x15c7   :  { %v964_v60 = vmul.f32 %v962_v59, %v947_v54 }
0x15c9   :  { %v965_v61 = vmax.f32 %v964_v60, 0.0 }
0x15cb   :  { %967 = vrot.lane.b32.xlu1 %v965_v61, %s1273_s5 }
0x163d   :  { %v968_v22 = vpop.permute.xlu1 %967 }
0x163e   :  { %970 = vst.msk [vmem:[#allocation2] sm:$0xff] %vm174_vm5, %v968_v22 }
0x163f   :  { %1256 = shalt.err (!%p1253_p4)
}
0x1640   :  { %s1257_s22 = scalar_lea.hbm %s1520_s4, 128 }
0x1641   :  { %p1258_p5 = scmp.ne.s32.totalorder %s1520_s4, %s1257_s22  ;;  %p1261_p6 = scmp.lt.u32.totalorder %s1257_s22, %s1520_s4 }
0x1643   :  { %p1263_p7 = pnand %p1261_p6, %p1258_p5 }
0x1645   :  { %1266 = shalt.err (!%p1263_p7)
}
0x1646   :  { %980 = dma.vmem_to_hbm [thread:$0]  %s978_s18, 128, %s1520_s4, [#allocation3]  }
0x1647   :  { %1267 = dma.done.wait [#allocation3], 128  }
0x1648   :  { %1268 = vsyncadd [#allocation3], 4294967168 }
0x1649   :  { %984 = vsyncpa [#allocation3], 1 }

</bundles_post_ra>
